<compile_context>
chip_gen: v7x
topology: tpu7x:2x2x1
jax: 0.10.0
libtpu: 0.0.40
codegen_flags: <defaults>
</compile_context>

<pallas_src>
import jax
import jax.numpy as jnp
from jax.experimental import pallas as pl
from jax.experimental.pallas import tpu as pltpu

LN_EPS = 1e-5        # nn.LayerNorm default eps (module uses the default)
MOMENTUM = 0.9


# --------------------------------------------------------------------------- helpers
def _pick_row_tile(rows: int) -> int:
    """Largest row tile that divides `rows`, is a multiple of 8, and is <= 1024."""
    if rows <= 512:
        return rows                       # block == full dim satisfies the (8,128) rule
    for t in range(min(rows, 1024), 7, -1):
        if rows % t == 0 and t % 8 == 0:
            return t
    return rows


def _pick_k_tile(k: int) -> int:
    if k <= 1024:
        return k
    for t in (1024, 512, 256, 128):
        if k % t == 0:
            return t
    return k


def _vmem_limit(est_bytes: int) -> int:
    # Explicit scoped-VMEM budget: lift the 16/32 MiB default when useful, but stay
    # under ~48 MiB so the same configuration also fits v7x's 64 MiB physical VMEM.
    return int(min(max(2 * est_bytes, 32 * 1024 * 1024), 48 * 1024 * 1024))


# ------------------------------------------------------------------ importance + prune
def _importance_prune_kernel(
    ho_ref,      # (TILE_R, HD)  f32  VMEM   rows of head outputs
    w1_ref,      # (HD, HD2)     bf16 VMEM   Linear1 weight (x @ W layout)
    b1_ref,      # (1, HD2)      f32  VMEM
    g_ref,       # (1, HD2)      f32  VMEM   LayerNorm gamma
    beta_ref,    # (1, HD2)      f32  VMEM   LayerNorm beta
    w2_ref,      # (1, HD2)      f32  VMEM   Linear2 weight (out_features=1)
    b2_ref,      # (1,)          f32  SMEM
    thr_ref,     # (B,)          f32  SMEM   per-batch threshold
    pruned_ref,  # (TILE_R, HD)  out
    imp_ref,     # (TILE_R, 1)   out
):
    b = pl.program_id(0)

    ho = ho_ref[...]                        # load the tile once; reused for the masked store

    # Linear(HD -> HD//2) on the MXU: bf16 operands, f32 accumulation.
    h = jnp.dot(ho.astype(jnp.bfloat16), w1_ref[...],
                preferred_element_type=jnp.float32) + b1_ref[...]

    # One-pass LayerNorm statistics: var = E[h^2] - mu^2.
    mu = jnp.mean(h, axis=-1, keepdims=True)
    ms = jnp.mean(h * h, axis=-1, keepdims=True)
    hn = (h - mu) * jax.lax.rsqrt(ms - mu * mu + LN_EPS) * g_ref[...] + beta_ref[...]

    hr = jnp.maximum(hn, 0.0)               # ReLU

    # Linear(HD//2 -> 1) as a VPU multiply + lane reduction (a width-1 MXU matmul
    # would waste 127/128 output columns and serialize behind Linear1).
    logits = jnp.sum(hr * w2_ref[...], axis=-1, keepdims=True) + b2_ref[0]
    scores = jax.nn.sigmoid(logits)          # (TILE_R, 1) f32

    imp_ref[...] = scores                    # (N,1) layout accepted knowingly (tiny tensor)

    mask = (scores > thr_ref[b]).astype(ho.dtype)
    pruned_ref[...] = ho * mask


def _importance_prune(ho3, thr_b, params):
    """ho3: (B, S*NH, HD) f32, thr_b: (B,) f32 -> (pruned (B,R,HD), importance (B,R,1))."""
    B, R, HD = ho3.shape
    HD2 = params["imp_w1"].shape[1]
    tile_r = _pick_row_tile(R)
    grid = (B, R // tile_r)

    est = (4 * tile_r * HD * 4               # ho + pruned tiles, double buffered
           + 2 * tile_r * 4                  # importance tile
           + 2 * (HD * HD2 * 2 + 4 * HD2 * 4)
           + 4 * tile_r * HD2 * 4)           # intermediates headroom

    pruned3, imp3 = pl.pallas_call(
        _importance_prune_kernel,
        grid=grid,
        in_specs=[
            pl.BlockSpec((None, tile_r, HD), lambda b, t: (b, t, 0)),   # head outputs
            pl.BlockSpec((HD, HD2), lambda b, t: (0, 0)),               # w1 (bf16)
            pl.BlockSpec((1, HD2), lambda b, t: (0, 0)),                # b1
            pl.BlockSpec((1, HD2), lambda b, t: (0, 0)),                # gamma
            pl.BlockSpec((1, HD2), lambda b, t: (0, 0)),                # beta
            pl.BlockSpec((1, HD2), lambda b, t: (0, 0)),                # w2
            pl.BlockSpec(memory_space=pltpu.MemorySpace.SMEM),          # b2 scalar
            pl.BlockSpec(memory_space=pltpu.MemorySpace.SMEM),          # thresholds (B,)
        ],
        out_specs=(
            pl.BlockSpec((None, tile_r, HD), lambda b, t: (b, t, 0)),
            pl.BlockSpec((None, tile_r, 1), lambda b, t: (b, t, 0)),
        ),
        out_shape=(
            jax.ShapeDtypeStruct((B, R, HD), ho3.dtype),
            jax.ShapeDtypeStruct((B, R, 1), jnp.float32),
        ),
        compiler_params=pltpu.CompilerParams(
            dimension_semantics=("parallel", "parallel"),
            vmem_limit_bytes=_vmem_limit(est),
        ),
    )(
        ho3,
        params["imp_w1"].astype(jnp.bfloat16),
        params["imp_b1"],
        params["imp_gamma"],
        params["imp_beta"],
        params["imp_w2"],
        params["imp_b2"].reshape(1).astype(jnp.float32),
        thr_b.astype(jnp.float32),
    )
    return pruned3, imp3


# ------------------------------------------------------------------------ threshold net
def _threshold_kernel(
    xm_ref,    # (B, TILE_K)   f32  VMEM
    w1_ref,    # (TILE_K, H4)  bf16 VMEM
    b1_ref,    # (1, H4)       f32  VMEM
    w2_ref,    # (1, H4)       f32  VMEM
    b2_ref,    # (1,)          f32  SMEM
    thr_ref,   # (B, 1)        out
    acc_ref,   # (B, H4)       f32  VMEM scratch
):
    k = pl.program_id(0)

    @pl.when(k == 0)
    def _():
        acc_ref[...] = jnp.zeros_like(acc_ref)

    acc_ref[...] += jnp.dot(xm_ref[...].astype(jnp.bfloat16), w1_ref[...],
                            preferred_element_type=jnp.float32)

    @pl.when(k == pl.num_programs(0) - 1)
    def _():
        h = jnp.maximum(acc_ref[...] + b1_ref[...], 0.0)                 # ReLU
        logits = jnp.sum(h * w2_ref[...], axis=-1, keepdims=True) + b2_ref[0]
        thr_ref[...] = jax.nn.sigmoid(logits)


def _threshold_forward(xm, params):
    """xm: (B, H) f32 -> threshold (B, 1) f32."""
    B, H = xm.shape
    H4 = params["thr_w1"].shape[1]
    tile_k = _pick_k_tile(H)
    grid = (H // tile_k,)

    est = (2 * B * tile_k * 4 + 2 * tile_k * H4 * 2
           + B * H4 * 4 + 2 * H4 * 4 + 2 * B * 4)

    thr = pl.pallas_call(
        _threshold_kernel,
        grid=grid,
        in_specs=[
            pl.BlockSpec((B, tile_k), lambda k: (0, k)),
            pl.BlockSpec((tile_k, H4), lambda k: (k, 0)),
            pl.BlockSpec((1, H4), lambda k: (0, 0)),
            pl.BlockSpec((1, H4), lambda k: (0, 0)),
            pl.BlockSpec(memory_space=pltpu.MemorySpace.SMEM),
        ],
        out_specs=pl.BlockSpec((B, 1), lambda k: (0, 0)),
        out_shape=jax.ShapeDtypeStruct((B, 1), jnp.float32),
        scratch_shapes=[pltpu.VMEM((B, H4), jnp.float32)],
        compiler_params=pltpu.CompilerParams(
            dimension_semantics=("arbitrary",),
            vmem_limit_bytes=_vmem_limit(est),
        ),
    )(
        xm.astype(jnp.float32),
        params["thr_w1"].astype(jnp.bfloat16),
        params["thr_b1"],
        params["thr_w2"],
        params["thr_b2"].reshape(1).astype(jnp.float32),
    )
    return thr


# --------------------------------------------------------------------------- forward
def dynamic_head_pruning(x, head_outputs, params, buffers):
    """x: (B,S,H) f32, head_outputs: (B,S,NH,HD) f32. Returns (pruned_outputs, stats)."""
    B, S, H = x.shape
    _, _, NH, HD = head_outputs.shape
    assert NH * HD == H, "hidden_size must equal num_heads * head_dim"

    # threshold_net(x.mean(dim=1))  — the seq mean is cheap plain-JAX glue.
    xm = jnp.mean(x, axis=1)                               # (B, H)
    threshold = _threshold_forward(xm, params)             # (B, 1)

    # importance_net shared across heads -> flatten heads into rows of head_dim.
    ho3 = head_outputs.reshape(B, S * NH, HD)
    pruned3, imp3 = _importance_prune(ho3, threshold.reshape(B), params)

    pruned_outputs = pruned3.reshape(B, S, NH, HD)
    head_importance = imp3.reshape(B, S, NH)

    # Per-batch threshold (intended broadcast); identical f32 compare as in-kernel.
    mask = head_importance > threshold[:, :, None]         # (B, S, NH) bool
    pruning_rate = jnp.mean(1.0 - mask.astype(jnp.float32))

    # ---- registered-buffer EMA updates (torch.no_grad block), done functionally ----
    new_importance_history = (
        MOMENTUM * buffers["head_importance_history"]
        + (1.0 - MOMENTUM) * head_importance.mean(axis=(0, 1))
    )
    new_pruning_rate_history = (
        MOMENTUM * buffers["pruning_rate_history"]
        + (1.0 - MOMENTUM) * pruning_rate
    )

    stats = {
        "head_importance": head_importance,
        "threshold": threshold,
        "mask": mask,
        "pruning_rate": pruning_rate,
        "importance_history": new_importance_history,
        "pruning_rate_history": new_pruning_rate_history,
    }
    return pruned_outputs, stats


# ------------------------------------------------------------------------ param setup
def init_params(key, hidden_size, num_heads):
    """Deterministic synthetic parameters matching the module's layer shapes.
    Linear weights are stored transposed vs torch ((in, out)) so kernels do x @ W."""
    hd = hidden_size // num_heads
    hd2 = hd // 2
    h4 = hidden_size // 4
    k1, k2, k3, k4 = jax.random.split(key, 4)
    return {
        # importance_net
        "imp_w1": 0.02 * jax.random.normal(k1, (hd, hd2), jnp.float32),
        "imp_b1": jnp.zeros((1, hd2), jnp.float32),
        "imp_gamma": jnp.ones((1, hd2), jnp.float32),     # LayerNorm weight
        "imp_beta": jnp.zeros((1, hd2), jnp.float32),     # LayerNorm bias
        "imp_w2": 0.2 * jax.random.normal(k2, (1, hd2), jnp.float32),
        "imp_b2": jnp.zeros((1,), jnp.float32),
        # threshold_net
        "thr_w1": 0.02 * jax.random.normal(k3, (hidden_size, h4), jnp.float32),
        "thr_b1": jnp.zeros((1, h4), jnp.float32),
        "thr_w2": 0.2 * jax.random.normal(k4, (1, h4), jnp.float32),
        "thr_b2": jnp.zeros((1,), jnp.float32),
    }


def init_buffers(num_heads):
    return {
        "head_importance_history": jnp.zeros((num_heads,), jnp.float32),
        "pruning_rate_history": jnp.float32(0.0),
    }


if __name__ == "__main__":
    key = jax.random.PRNGKey(0)
    kx, kh, kp = jax.random.split(key, 3)

    B, S, NH, HD = 2, 8, 4, 8           # hidden_size = NH * HD = 32
    H = NH * HD
    x = jax.random.normal(kx, (B, S, H), jnp.float32)
    head_outputs = jax.random.normal(kh, (B, S, NH, HD), jnp.float32)
    params = init_params(kp, H, NH)
    buffers = init_buffers(NH)

    pruned, stats = dynamic_head_pruning(x, head_outputs, params, buffers)
    jax.block_until_ready(pruned)
    jax.block_until_ready(stats["head_importance"])

    assert pruned.shape == (B, S, NH, HD)
    assert stats["head_importance"].shape == (B, S, NH)
    assert stats["threshold"].shape == (B, 1)
    assert stats["mask"].shape == (B, S, NH)
    assert stats["importance_history"].shape == (NH,)
    assert bool(jnp.all(jnp.isfinite(stats["head_importance"])))
    assert bool(jnp.all(jnp.isfinite(pruned)))
    print("KERNEL_OK")
</pallas_src>

<mosaic_0001>
module attributes {stable_mosaic.version = 11 : i64} {
  func.func @_threshold_kernel(%arg0: i32, %arg1: memref<2x32xf32, #tpu.memory_space<vmem>>, %arg2: memref<32x8xbf16, #tpu.memory_space<vmem>>, %arg3: memref<1x8xf32, #tpu.memory_space<vmem>>, %arg4: memref<1x8xf32, #tpu.memory_space<vmem>>, %arg5: memref<1xf32, #tpu.memory_space<smem>>, %arg6: memref<2x1xf32, #tpu.memory_space<vmem>>, %arg7: memref<2x8xf32, #tpu.memory_space<vmem>>) attributes {dimension_semantics = [#tpu.dimension_semantics<arbitrary>], iteration_bounds = array<i64: 1>, scalar_prefetch = 0 : i64, scratch_operands = 1 : i64, tpu.core_type = #tpu.core_type<tc>, window_params = [{transform_indices = @transform_0, window_bounds = array<i64: 2, 32>}, {transform_indices = @transform_1, window_bounds = array<i64: 32, 8>}, {pipeline_mode = #tpu.pipeline_mode<synchronous>, transform_indices = @transform_2, window_bounds = array<i64: 1, 8>}, {pipeline_mode = #tpu.pipeline_mode<synchronous>, transform_indices = @transform_3, window_bounds = array<i64: 1, 8>}, {transform_indices = @transform_4, window_bounds = array<i64: 1>}, {pipeline_mode = #tpu.pipeline_mode<synchronous>, transform_indices = @transform_5, window_bounds = array<i64: 2, 1>}]} {
    %c0_i32 = arith.constant 0 : i32
    %0 = arith.cmpi eq, %arg0, %c0_i32 : i32
    %1 = arith.extui %0 : i1 to i32
    %c0_i32_0 = arith.constant 0 : i32
    %2 = arith.cmpi ne, %1, %c0_i32_0 : i32
    scf.if %2 {
      %cst_10 = arith.constant 0.000000e+00 : f32
      %13 = vector.broadcast %cst_10 : f32 to vector<2x8xf32>
      %c0_11 = arith.constant 0 : index
      %c0_12 = arith.constant 0 : index
      %14 = vector.load %arg7[%c0_11, %c0_12] : memref<2x8xf32, #tpu.memory_space<vmem>>, vector<2x8xf32>
      tpu.vector_store %arg7[%c0_11, %c0_12], %13 {strides = array<i32>} : memref<2x8xf32, #tpu.memory_space<vmem>>, vector<2x8xf32>,
    } else {
    }
    %c0 = arith.constant 0 : index
    %c0_1 = arith.constant 0 : index
    %3 = vector.load %arg7[%c0, %c0_1] : memref<2x8xf32, #tpu.memory_space<vmem>>, vector<2x8xf32>
    %c0_2 = arith.constant 0 : index
    %c0_3 = arith.constant 0 : index
    %4 = vector.load %arg1[%c0_2, %c0_3] : memref<2x32xf32, #tpu.memory_space<vmem>>, vector<2x32xf32>
    %5 = arith.truncf %4 : vector<2x32xf32> to vector<2x32xbf16>
    %c0_4 = arith.constant 0 : index
    %c0_5 = arith.constant 0 : index
    %6 = vector.load %arg2[%c0_4, %c0_5] : memref<32x8xbf16, #tpu.memory_space<vmem>>, vector<32x8xbf16>
    %cst = arith.constant dense<0.000000e+00> : vector<2x8xf32>
    %7 = tpu.matmul %5, %6, %cst {dimension_numbers = #tpu.dot_dimension_numbers<[1], [0], [0], [1], [0, 0, 1, 1], [], []>} : vector<2x32xbf16>, vector<32x8xbf16>, vector<2x8xf32> -> vector<2x8xf32>
    %8 = arith.addf %3, %7 : vector<2x8xf32>
    %c0_6 = arith.constant 0 : index
    %c0_7 = arith.constant 0 : index
    %9 = vector.load %arg7[%c0_6, %c0_7] : memref<2x8xf32, #tpu.memory_space<vmem>>, vector<2x8xf32>
    tpu.vector_store %arg7[%c0_6, %c0_7], %8 {strides = array<i32>} : memref<2x8xf32, #tpu.memory_space<vmem>>, vector<2x8xf32>,
    %c0_i32_8 = arith.constant 0 : i32
    %10 = arith.cmpi eq, %arg0, %c0_i32_8 : i32
    %11 = arith.extui %10 : i1 to i32
    %c0_i32_9 = arith.constant 0 : i32
    %12 = arith.cmpi ne, %11, %c0_i32_9 : i32
    scf.if %12 {
      %c0_10 = arith.constant 0 : index
      %c0_11 = arith.constant 0 : index
      %13 = vector.load %arg7[%c0_10, %c0_11] : memref<2x8xf32, #tpu.memory_space<vmem>>, vector<2x8xf32>
      %c0_12 = arith.constant 0 : index
      %c0_13 = arith.constant 0 : index
      %14 = vector.load %arg3[%c0_12, %c0_13] : memref<1x8xf32, #tpu.memory_space<vmem>>, vector<1x8xf32>
      %15 = vector.broadcast %14 : vector<1x8xf32> to vector<2x8xf32>
      %16 = arith.addf %13, %15 : vector<2x8xf32>
      %cst_14 = arith.constant 0.000000e+00 : f32
      %17 = vector.broadcast %cst_14 : f32 to vector<2x8xf32>
      %18 = arith.maximumf %16, %17 : vector<2x8xf32>
      %c0_15 = arith.constant 0 : index
      %c0_16 = arith.constant 0 : index
      %19 = vector.load %arg4[%c0_15, %c0_16] : memref<1x8xf32, #tpu.memory_space<vmem>>, vector<1x8xf32>
      %20 = vector.broadcast %19 : vector<1x8xf32> to vector<2x8xf32>
      %21 = arith.mulf %18, %20 : vector<2x8xf32>
      %cst_17 = arith.constant dense<0.000000e+00> : vector<2xf32>
      %22 = vector.multi_reduction <add>, %21, %cst_17 [1] : vector<2x8xf32> to vector<2xf32>
      %23 = vector.shape_cast %22 : vector<2xf32> to vector<2x1xf32>
      %c0_18 = arith.constant 0 : index
      %24 = memref.load %arg5[%c0_18] : memref<1xf32, #tpu.memory_space<smem>>
      %25 = vector.broadcast %24 : f32 to vector<2x1xf32>
      %26 = arith.addf %23, %25 : vector<2x1xf32>
      %27 = arith.negf %26 : vector<2x1xf32>
      %28 = math.exp %27 : vector<2x1xf32>
      %cst_19 = arith.constant 1.000000e+00 : f32
      %29 = vector.broadcast %cst_19 : f32 to vector<2x1xf32>
      %30 = arith.addf %29, %28 : vector<2x1xf32>
      %31 = arith.divf %29, %30 : vector<2x1xf32>
      %c0_20 = arith.constant 0 : index
      %c0_21 = arith.constant 0 : index
      %32 = vector.load %arg6[%c0_20, %c0_21] : memref<2x1xf32, #tpu.memory_space<vmem>>, vector<2x1xf32>
      tpu.vector_store %arg6[%c0_20, %c0_21], %31 {strides = array<i32>} : memref<2x1xf32, #tpu.memory_space<vmem>>, vector<2x1xf32>,
    } else {
    }
    return
  }
  func.func @transform_0(%arg0: i32) -> (i32, i32) {
    %c0_i32 = arith.constant 0 : i32
    %c0_i32_0 = arith.constant 0 : i32
    return %c0_i32, %arg0 : i32, i32
  }
  func.func @transform_1(%arg0: i32) -> (i32, i32) {
    %c0_i32 = arith.constant 0 : i32
    %c0_i32_0 = arith.constant 0 : i32
    return %arg0, %c0_i32 : i32, i32
  }
  func.func @transform_2(%arg0: i32) -> (i32, i32) {
    %c0_i32 = arith.constant 0 : i32
    %c0_i32_0 = arith.constant 0 : i32
    %c0_i32_1 = arith.constant 0 : i32
    return %c0_i32, %c0_i32_0 : i32, i32
  }
  func.func @transform_3(%arg0: i32) -> (i32, i32) {
    %c0_i32 = arith.constant 0 : i32
    %c0_i32_0 = arith.constant 0 : i32
    %c0_i32_1 = arith.constant 0 : i32
    return %c0_i32, %c0_i32_0 : i32, i32
  }
  func.func @transform_4(%arg0: i32) -> i32 {
    %c0_i32 = arith.constant 0 : i32
    %c0_i32_0 = arith.constant 0 : i32
    return %c0_i32 : i32
  }
  func.func @transform_5(%arg0: i32) -> (i32, i32) {
    %c0_i32 = arith.constant 0 : i32
    %c0_i32_0 = arith.constant 0 : i32
    %c0_i32_1 = arith.constant 0 : i32
    return %c0_i32, %c0_i32_0 : i32, i32
  }
}

</mosaic_0001>

<bundles_post_ra>
// kernel: tpu_custom_call.1
= control target key start
LH: loop header
LB: loop body
LE: loop exit
PB: predicated region body
PF: predicated region fallthrough
CT: control target
= control target key end

     0   :  { %vm26_vm0 = vcmask 58368   ;;  %v158_v0 = vmov 0.0   ;;  %vm159_vm1 = vmmov 0   ;;  %vm47_vm2 = vcmask 261120   ;;  %s214_s1 = inlined_call_operand.vmem [shape: bf16[32,8], index: 1, kind: input, shape index: {}]   ;;  %s215_s0 = inlined_call_operand.vmem [shape: f32[2,32], index: 0, kind: input, shape index: {}]   ;;  %s216_s2 = inlined_call_operand.vmem [shape: f32[1,8], index: 2, kind: input, shape index: {}]   ;;  %s217_s3 = inlined_call_operand.vmem [shape: f32[1,8], index: 3, kind: input, shape index: {}]   ;;  %s218_s4 = inlined_call_operand.<no memory space> [shape: f32[1], index: 4, kind: input, shape index: {}]   ;;  %s219_s5 = inlined_call_operand.vmem [shape: f32[2,1], index: 5, kind: output, shape index: {}]  }
   0x1   :  { %142 = vmatprep.subr.bf16.mxu0 %v158_v0  ;;  %v152_v1 = vld [vmem:[%s214_s1] sm:$0xff]   ;;  %146 = vmatprep.mubr.msk.bf16.mxu0 %vm159_vm1, %v158_v0  ;;  %27 = vst.msk [vmem:[#allocation2] sm:$0x3] %vm26_vm0, %v158_v0  ;;  %v153_v2 = vld [vmem:[%s214_s1 + $0x8] sm:$0xff]   ;;  %v119_v18 = vstv %s218_s4  ;;  %vm127_vm3 = vcmask 1024  }
   0x2   :  { %143 = vmatpush3.bf16.msra.mxu0 %v152_v1  ;;  %v29_v3 = vld [vmem:[%s215_s0] sm:$0x3] }
   0x3   :  { %144 = vmatprep.subr.bf16.mxu0 %v158_v0  ;;  %v30_v4 = vpack.c.bf16 %v29_v3, %v29_v3  ;;  %v136_v11 = vld [vmem:[%s216_s2] ss:$0 sm:$0xff] }
   0x4   :  { %v137_v14 = vld [vmem:[%s217_s3] ss:$0 sm:$0xff] }
   0x6   :  { %145 = vmatpush3.bf16.msra.mxu0 %v153_v2 }
   0x8   :  { %v28_v5 = vld [vmem:[#allocation2] sm:$0x3] }
   0x9   :  { %147 = vmatmul.mubr.msk.bf16.vlgmr.msra.gmra.mrb[0].mxu0 %vm47_vm2, %v30_v4 }
  0xdc   :  { %v85_v6 = vpop.f32.mrb[0].mxu0 }
  0xdd   :  { %v91_v7 = vadd.f32 %v85_v6, %v28_v5  ;;  %v148_v8 = vpop.f32.mrb[1].mxu0 }
  0xde   :  { %v88_v9 = vpop.f32.mrb[2].mxu0 }
  0xdf   :  { %93 = vst.msk [vmem:[#allocation2] sm:$0x3] %vm26_vm0, %v91_v7  ;;  %v149_v10 = vpop.f32.mrb[3].mxu0 }
  0xe6   :  { %v97_v12 = vld [vmem:[#allocation2] sm:$0x3] }
  0xe7   :  { %v105_v13 = vadd.f32 %v136_v11, %v97_v12 }
  0xe9   :  { %v106_v15 = vmax.f32 %v105_v13, 0.0 }
  0xeb   :  { %v114_v16 = vmul.f32 %v137_v14, %v106_v15 }
  0xed   :  { %v115_v17 = vsel %vm26_vm0, %v114_v16, 0.0 }
  0xee   :  { %116 = vadd.xlane.f32.xlu0 %v115_v17 }
 0x17b   :  { %v117_v19 = vpop.xlane.xlu0 %116 }
 0x17c   :  { %v120_v20 = vadd.f32 %v119_v18, %v117_v19 }
 0x17e   :  { %v138_v21 = vmul.f32 -1.442695, %v120_v20 }
 0x180   :  { %154 = vpow2.f32 %v138_v21 }
 0x18a   :  { %v155_v22 = vpop.eup %154 }
 0x18b   :  { %v124_v23 = vadd.f32 1.0, %v155_v22 }
 0x18d   :  { %156 = vrcp.f32 %v124_v23 }
 0x197   :  { %v157_v24 = vpop.eup %156 }
 0x198   :  { %128 = vst.msk [vmem:[%s219_s5] sm:$0x3] %vm127_vm3, %v157_v24 }

</bundles_post_ra>
